<compile_context>
chip_gen: v7x
topology: tpu7x:2x2x1
jax: 0.10.0
libtpu: 0.0.40
codegen_flags: <defaults>
</compile_context>

<pallas_src>
import functools

import jax
import jax.numpy as jnp
from jax.experimental import pallas as pl
from jax.experimental.pallas import tpu as pltpu


# ----------------------------- static helpers -----------------------------

def _cdiv(a, b):
    return -(-a // b)


def _round_up(n, m):
    return _cdiv(n, m) * m


def _pack_factor(n_channels, len_sw, lanes=128):
    """How many batch rows to fold into one lane-dense packed row."""
    base = n_channels * len_sw
    if base < lanes and lanes % base == 0:
        return lanes // base
    return 1


# ----------------------------- parameter construction -----------------------------

def make_ae_params(key, n_channels, len_sw, outdim, dtype=jnp.float32):
    """PyTorch-style params (weights stored transposed as (in, out), biases (1, out))."""
    dims = [
        (n_channels, 8),            # e1
        (8 * len_sw, 2 * len_sw),   # e2
        (2 * len_sw, outdim),       # e3
        (outdim, 2 * len_sw),       # d1
        (2 * len_sw, 8 * len_sw),   # d2
        (8, n_channels),            # d3
    ]
    params = []
    for (fan_in, fan_out) in dims:
        key, kw, kb = jax.random.split(key, 3)
        bound = 1.0 / jnp.sqrt(jnp.float32(fan_in))
        w = jax.random.uniform(kw, (fan_in, fan_out), dtype, -bound, bound)
        b = jax.random.uniform(kb, (1, fan_out), dtype, -bound, bound)
        params.extend([w, b])
    return params


def fuse_and_pack_params(params, n_channels, len_sw, outdim, dtype=None):
    """Fold e1->e2 and d3->d2, kron-pack P batch rows into lanes, pad to (4, K, K)/(4, K)."""
    w1, b1, w2, b2, w3, b3, w4, b4, w5, b5, w6, b6 = params
    L, C, D = len_sw, n_channels, outdim
    P = _pack_factor(C, L)
    f32 = jnp.float32

    b1, b2, b3, b4, b5, b6 = (b.reshape(-1).astype(f32) for b in (b1, b2, b3, b4, b5, b6))
    w1f, w2f, w3f, w4f, w5f, w6f = (w.astype(f32) for w in (w1, w2, w3, w4, w5, w6))

    eye_l = jnp.eye(L, dtype=f32)
    bd1 = jnp.kron(eye_l, w1f)                      # (L*C, 8L) block-diag of e1
    bd6 = jnp.kron(eye_l, w6f)                      # (8L, L*C) block-diag of d3

    w_e = bd1 @ w2f                                 # (L*C, 2L)
    b_e = jnp.tile(b1, L) @ w2f + b2                # (2L,)
    w_d = w5f @ bd6                                 # (2L, L*C)
    b_d = b5 @ bd6 + jnp.tile(b6, L)                # (L*C,)

    weights = [w_e, w3f, w4f, w_d]                  # fused e1+e2, e3, d1, fused d2+d3
    biases = [b_e, b3, b4, b_d]

    if P > 1:                                       # lane-pack P batch rows per packed row
        eye_p = jnp.eye(P, dtype=f32)
        weights = [jnp.kron(eye_p, w) for w in weights]
        biases = [jnp.tile(b, P) for b in biases]

    K = _round_up(max(max(w.shape) for w in weights), 128)
    out_dtype = dtype if dtype is not None else params[0].dtype

    wp = jnp.zeros((len(weights), K, K), out_dtype)
    bp = jnp.zeros((len(biases), K), f32)
    for i, (w, b) in enumerate(zip(weights, biases)):
        fi, fo = w.shape
        wp = wp.at[i, :fi, :fo].set(w.astype(out_dtype))
        bp = bp.at[i, :fo].set(b)
    return wp, bp, P


# ----------------------------------- kernel -----------------------------------

def ae_fused_kernel(x_ref, wp_ref, bp_ref, out_ref):
    """Four chained (bm, K) @ (K, K) matmuls, f32 accumulation, one fused output slab."""
    k = wp_ref.shape[-1]
    cdt = wp_ref.dtype                              # compute dtype (f32 or bf16)

    h = x_ref[...].astype(cdt)                      # (bm, K)
    enc = None
    for i in range(wp_ref.shape[0]):                # unrolled: 4 fused layers
        acc = jnp.dot(h, wp_ref[i], preferred_element_type=jnp.float32)
        acc = acc + bp_ref[i:i + 1, :]              # (1, K) bias broadcast, f32
        h = acc.astype(cdt)
        if i == 1:
            enc = h                                 # encoder output (after e3)

    out_ref[:, :k] = h.astype(out_ref.dtype)        # decoded slab (lane-dense, 128-aligned)
    out_ref[:, k:] = enc.astype(out_ref.dtype)      # encoded slab


# ----------------------------------- wrapper -----------------------------------

@functools.partial(jax.jit,
                   static_argnames=("len_sw", "n_channels", "outdim", "pack", "block_rows"))
def ae_forward(x, w_packed, b_packed, *, len_sw, n_channels, outdim, pack, block_rows=8192):
    """Forward of AE(backbone=True): returns (x_decoded, x_encoded)."""
    B = x.shape[0]
    L, C, D, P = len_sw, n_channels, outdim, pack
    n_layers, K = w_packed.shape[0], w_packed.shape[-1]

    # ---- choose packed-row block size (all static Python ints) ----
    bp_raw = _cdiv(B, P)                            # packed rows of real data
    bm_target = max(8, _round_up(max(1, block_rows // P), 8))
    if bp_raw >= 2 * bm_target:
        bm = bm_target
    elif bp_raw >= 16:
        bm = _round_up(_cdiv(bp_raw, 2), 8)         # >=2 grid steps: dual-TC on v7x
    else:
        bm = 8
    bp_rows = _round_up(bp_raw, bm)                 # padded packed rows -> full blocks only
    grid_b = bp_rows // bm
    b_pad = bp_rows * P

    # ---- pack activations: P batch rows per lane-dense packed row ----
    x_flat = x.reshape(B, L * C)
    if b_pad != B:
        x_flat = jnp.pad(x_flat, ((0, b_pad - B), (0, 0)))
    x_packed = x_flat.reshape(bp_rows, P * L * C)
    if P * L * C != K:
        x_packed = jnp.pad(x_packed, ((0, 0), (0, K - P * L * C)))

    # ---- explicit VMEM budget (v7x 64 MiB safe; raises v5e's 16 MiB scoped default) ----
    act_i = jnp.dtype(x.dtype).itemsize
    w_i = jnp.dtype(w_packed.dtype).itemsize
    need = (2 * (bm * K * act_i + bm * 2 * K * act_i)        # double-buffered in/out blocks
            + n_layers * K * K * w_i + n_layers * K * 4      # resident weights + biases
            + 5 * bm * K * 4)                                # f32 intermediates
    vmem_limit = int(min(max(2 * need, 16 * 2**20), 64 * 2**20))

    out = pl.pallas_call(
        ae_fused_kernel,
        out_shape=jax.ShapeDtypeStruct((bp_rows, 2 * K), x.dtype),
        grid=(grid_b,),
        in_specs=[
            pl.BlockSpec((bm, K), lambda i: (i, 0)),                  # streamed activations
            pl.BlockSpec(w_packed.shape, lambda i: (0, 0, 0)),        # weights: VMEM-resident
            pl.BlockSpec(b_packed.shape, lambda i: (0, 0)),           # biases:  VMEM-resident
        ],
        out_specs=pl.BlockSpec((bm, 2 * K), lambda i: (i, 0)),        # fused dec|enc slab
        compiler_params=pltpu.CompilerParams(
            dimension_semantics=("parallel",),                        # megacore / dual-TC
            vmem_limit_bytes=vmem_limit,
        ),
    )(x_packed, w_packed, b_packed)

    dec = out[:, :P * L * C].reshape(b_pad, L * C)[:B].reshape(B, L, C)
    enc = out[:, K:K + P * D].reshape(b_pad, D)[:B]
    return dec, enc


# --------------------------------- reference ---------------------------------

def ae_reference(x, params, len_sw):
    """Pure-JAX reference of the PyTorch forward (backbone=True), uncomposed params."""
    w1, b1, w2, b2, w3, b3, w4, b4, w5, b5, w6, b6 = params
    B = x.shape[0]
    h1 = x @ w1 + b1
    h1 = h1.reshape(B, -1)
    h2 = h1 @ w2 + b2
    enc = h2 @ w3 + b3
    d1 = enc @ w4 + b4
    d2 = d1 @ w5 + b5
    d2 = d2.reshape(B, len_sw, 8)
    dec = d2 @ w6 + b6
    return dec, enc


if __name__ == "__main__":
    # Small shapes consistent with the module: batch=2, len_sw=8, n_channels=4, outdim=32.
    B, L, C, OUTDIM = 2, 8, 4, 32

    key = jax.random.PRNGKey(0)
    kx, kp = jax.random.split(key)
    x = jax.random.normal(kx, (B, L, C), jnp.float32)
    params = make_ae_params(kp, n_channels=C, len_sw=L, outdim=OUTDIM)

    # Compose + lane-pack parameters once, outside the jit hot path.
    w_packed, b_packed, pack = fuse_and_pack_params(params, C, L, OUTDIM)

    dec, enc = ae_forward(x, w_packed, b_packed,
                          len_sw=L, n_channels=C, outdim=OUTDIM, pack=pack)
    jax.block_until_ready((dec, enc))

    dec_ref, enc_ref = ae_reference(x, params, L)
    assert dec.shape == (B, L, C) and enc.shape == (B, OUTDIM)
    assert jnp.allclose(enc, enc_ref, atol=1e-4, rtol=1e-4)
    assert jnp.allclose(dec, dec_ref, atol=1e-4, rtol=1e-4)

    print("KERNEL_OK")
</pallas_src>

<mosaic_0001>
module attributes {stable_mosaic.version = 11 : i64} {
  func.func @ae_fused_kernel(%arg0: i32, %arg1: memref<8x128xf32, #tpu.memory_space<vmem>>, %arg2: memref<4x128x128xf32, #tpu.memory_space<vmem>>, %arg3: memref<4x128xf32, #tpu.memory_space<vmem>>, %arg4: memref<8x256xf32, #tpu.memory_space<vmem>>) attributes {dimension_semantics = [#tpu.dimension_semantics<parallel>], iteration_bounds = array<i64: 1>, scalar_prefetch = 0 : i64, scratch_operands = 0 : i64, tpu.core_type = #tpu.core_type<tc>, window_params = [{transform_indices = @transform_0, window_bounds = array<i64: 8, 128>}, {pipeline_mode = #tpu.pipeline_mode<synchronous>, transform_indices = @transform_1, window_bounds = array<i64: 4, 128, 128>}, {pipeline_mode = #tpu.pipeline_mode<synchronous>, transform_indices = @transform_2, window_bounds = array<i64: 4, 128>}, {transform_indices = @transform_3, window_bounds = array<i64: 8, 256>}]} {
    %c0 = arith.constant 0 : index
    %c0_0 = arith.constant 0 : index
    %0 = vector.load %arg1[%c0, %c0_0] : memref<8x128xf32, #tpu.memory_space<vmem>>, vector<8x128xf32>
    %c0_1 = arith.constant 0 : index
    %c0_2 = arith.constant 0 : index
    %c0_3 = arith.constant 0 : index
    %1 = vector.load %arg2[%c0_1, %c0_2, %c0_3] : memref<4x128x128xf32, #tpu.memory_space<vmem>>, vector<1x128x128xf32>
    %2 = vector.shape_cast %1 : vector<1x128x128xf32> to vector<128x128xf32>
    %cst = arith.constant dense<0.000000e+00> : vector<8x128xf32>
    %3 = tpu.matmul %0, %2, %cst {dimension_numbers = #tpu.dot_dimension_numbers<[1], [0], [0], [1], [0, 0, 1, 1], [], []>} : vector<8x128xf32>, vector<128x128xf32>, vector<8x128xf32> -> vector<8x128xf32>
    %c0_4 = arith.constant 0 : index
    %c0_5 = arith.constant 0 : index
    %4 = vector.load %arg3[%c0_4, %c0_5] : memref<4x128xf32, #tpu.memory_space<vmem>>, vector<1x128xf32>
    %5 = vector.broadcast %4 : vector<1x128xf32> to vector<8x128xf32>
    %6 = arith.addf %3, %5 : vector<8x128xf32>
    %c1 = arith.constant 1 : index
    %c0_6 = arith.constant 0 : index
    %c0_7 = arith.constant 0 : index
    %7 = vector.load %arg2[%c1, %c0_6, %c0_7] : memref<4x128x128xf32, #tpu.memory_space<vmem>>, vector<1x128x128xf32>
    %8 = vector.shape_cast %7 : vector<1x128x128xf32> to vector<128x128xf32>
    %cst_8 = arith.constant dense<0.000000e+00> : vector<8x128xf32>
    %9 = tpu.matmul %6, %8, %cst_8 {dimension_numbers = #tpu.dot_dimension_numbers<[1], [0], [0], [1], [0, 0, 1, 1], [], []>} : vector<8x128xf32>, vector<128x128xf32>, vector<8x128xf32> -> vector<8x128xf32>
    %c1_9 = arith.constant 1 : index
    %c0_10 = arith.constant 0 : index
    %10 = vector.load %arg3[%c1_9, %c0_10] : memref<4x128xf32, #tpu.memory_space<vmem>>, vector<1x128xf32>
    %11 = vector.broadcast %10 : vector<1x128xf32> to vector<8x128xf32>
    %12 = arith.addf %9, %11 : vector<8x128xf32>
    %c2 = arith.constant 2 : index
    %c0_11 = arith.constant 0 : index
    %c0_12 = arith.constant 0 : index
    %13 = vector.load %arg2[%c2, %c0_11, %c0_12] : memref<4x128x128xf32, #tpu.memory_space<vmem>>, vector<1x128x128xf32>
    %14 = vector.shape_cast %13 : vector<1x128x128xf32> to vector<128x128xf32>
    %cst_13 = arith.constant dense<0.000000e+00> : vector<8x128xf32>
    %15 = tpu.matmul %12, %14, %cst_13 {dimension_numbers = #tpu.dot_dimension_numbers<[1], [0], [0], [1], [0, 0, 1, 1], [], []>} : vector<8x128xf32>, vector<128x128xf32>, vector<8x128xf32> -> vector<8x128xf32>
    %c2_14 = arith.constant 2 : index
    %c0_15 = arith.constant 0 : index
    %16 = vector.load %arg3[%c2_14, %c0_15] : memref<4x128xf32, #tpu.memory_space<vmem>>, vector<1x128xf32>
    %17 = vector.broadcast %16 : vector<1x128xf32> to vector<8x128xf32>
    %18 = arith.addf %15, %17 : vector<8x128xf32>
    %c3 = arith.constant 3 : index
    %c0_16 = arith.constant 0 : index
    %c0_17 = arith.constant 0 : index
    %19 = vector.load %arg2[%c3, %c0_16, %c0_17] : memref<4x128x128xf32, #tpu.memory_space<vmem>>, vector<1x128x128xf32>
    %20 = vector.shape_cast %19 : vector<1x128x128xf32> to vector<128x128xf32>
    %cst_18 = arith.constant dense<0.000000e+00> : vector<8x128xf32>
    %21 = tpu.matmul %18, %20, %cst_18 {dimension_numbers = #tpu.dot_dimension_numbers<[1], [0], [0], [1], [0, 0, 1, 1], [], []>} : vector<8x128xf32>, vector<128x128xf32>, vector<8x128xf32> -> vector<8x128xf32>
    %c3_19 = arith.constant 3 : index
    %c0_20 = arith.constant 0 : index
    %22 = vector.load %arg3[%c3_19, %c0_20] : memref<4x128xf32, #tpu.memory_space<vmem>>, vector<1x128xf32>
    %23 = vector.broadcast %22 : vector<1x128xf32> to vector<8x128xf32>
    %24 = arith.addf %21, %23 : vector<8x128xf32>
    %c0_21 = arith.constant 0 : index
    %c0_22 = arith.constant 0 : index
    %25 = vector.load %arg4[%c0_21, %c0_22] : memref<8x256xf32, #tpu.memory_space<vmem>>, vector<8x128xf32>
    tpu.vector_store %arg4[%c0_21, %c0_22], %24 {strides = array<i32>} : memref<8x256xf32, #tpu.memory_space<vmem>>, vector<8x128xf32>,
    %c0_23 = arith.constant 0 : index
    %c128 = arith.constant 128 : index
    %26 = vector.load %arg4[%c0_23, %c128] : memref<8x256xf32, #tpu.memory_space<vmem>>, vector<8x128xf32>
    tpu.vector_store %arg4[%c0_23, %c128], %12 {strides = array<i32>} : memref<8x256xf32, #tpu.memory_space<vmem>>, vector<8x128xf32>,
    return
  }
  func.func @transform_0(%arg0: i32) -> (i32, i32) {
    %c0_i32 = arith.constant 0 : i32
    %c0_i32_0 = arith.constant 0 : i32
    return %arg0, %c0_i32 : i32, i32
  }
  func.func @transform_1(%arg0: i32) -> (i32, i32, i32) {
    %c0_i32 = arith.constant 0 : i32
    %c0_i32_0 = arith.constant 0 : i32
    %c0_i32_1 = arith.constant 0 : i32
    %c0_i32_2 = arith.constant 0 : i32
    return %c0_i32, %c0_i32_0, %c0_i32_1 : i32, i32, i32
  }
  func.func @transform_2(%arg0: i32) -> (i32, i32) {
    %c0_i32 = arith.constant 0 : i32
    %c0_i32_0 = arith.constant 0 : i32
    %c0_i32_1 = arith.constant 0 : i32
    return %c0_i32, %c0_i32_0 : i32, i32
  }
  func.func @transform_3(%arg0: i32) -> (i32, i32) {
    %c0_i32 = arith.constant 0 : i32
    %c0_i32_0 = arith.constant 0 : i32
    return %arg0, %c0_i32 : i32, i32
  }
}

</mosaic_0001>

<bundles_post_ra>
// kernel: ae_forward.1
= control target key start
LH: loop header
LB: loop body
LE: loop exit
PB: predicated region body
PF: predicated region fallthrough
CT: control target
= control target key end

     0   :  { %8 = vsyncpa [#allocation3], 0  ;;  %s741_s12 = smov [#allocation2]   ;;  %s840_s0 = inlined_call_operand.vmem [shape: f32[8,128], index: 0, kind: input, shape index: {}]   ;;  %s841_s1 = inlined_call_operand.hbm [shape: f32[4,128,128], index: 1, kind: input, shape index: {}]   ;;  %s842_s2 = inlined_call_operand.vmem [shape: f32[4,128], index: 2, kind: input, shape index: {}]   ;;  %s843_s3 = inlined_call_operand.vmem [shape: f32[8,256], index: 3, kind: output, shape index: {}]  }
   0x1   :  { %s16_s13 = sshll.u32 %s741_s12, 4  ;;  %s717_s16 = scalar_lea.hbm %s841_s1, 8192  ;;  %s17_s13 = int_to_ptr.vmem [resolvable:$true] %s16_s13 }
   0x2   :  { %p718_p0 = scmp.ne.s32.totalorder %s841_s1, %s717_s16  ;;  %p721_p1 = scmp.lt.u32.totalorder %s717_s16, %s841_s1 }
   0x4   :  { %p723_p2 = pnand %p721_p1, %p718_p0 }
   0x6   :  { %726 = shalt.err (!%p723_p2)
}
   0x7   :  { %s727_s21 = scalar_lea.vmem %s17_s13, 8192  ;;  %p732_p4 = scmp.lt.s32.totalorder %s17_s13, %s17_s13 }
   0x8   :  { %p728_p3 = scmp.ne.s32.totalorder %s17_s13, %s727_s21  ;;  %p733_p5 = scmp.lt.s32.totalorder %s727_s21, %s727_s21 }
   0xa   :  { %p734_p6 = por %p733_p5, %p732_p4 }
   0xc   :  { %p735_p7 = pnand %p734_p6, %p728_p3 }
   0xe   :  { %738 = shalt.err (!%p735_p7)
}
   0xf   :  { %s742_s22 = smov 128   ;;  %s743_s23 = smov 8  }
  0x10   :  { %22 = dma.hbm_to_vmem [thread:$0]  %s841_s1, 8192, %s17_s13, [#allocation3], %s742_s22, %s742_s22, %s743_s23  }
  0x11   :  { %739 = dma.done.wait [#allocation3], 8192  }
  0x12   :  { %740 = vsyncadd [#allocation3], 4294959104  ;;  %v744_v0 = vmov 0.0|0.0   ;;  %vm745_vm0 = vmmov 0   ;;  %v746_v1 = vmov 0.0   ;;  %v29_v2 = vld [vmem:[#allocation2] sm:$0xff] }
  0x13   :  { %615 = vmatprep.subr.bf16.mxu0 %v744_v0  ;;  %507 = vmatprep.mubr.msk.f32.mxu0 %vm745_vm0, %v746_v1  ;;  %v30_v3 = vld [vmem:[#allocation2 + $0x8] sm:$0xff]  ;;  %v31_v4 = vld [vmem:[#allocation2 + $0x10] sm:$0xff]  ;;  %v32_v6 = vld [vmem:[#allocation2 + $0x18] sm:$0xff] }
  0x14   :  { %639 = vmatprep.subr.bf16.mxu1 %v744_v0  ;;  %542 = vmatprep.mubr.msk.f32.mxu1 %vm745_vm0, %v746_v1  ;;  %v616_v5 = vpack.c.bf16 %v30_v3, %v29_v2  ;;  %v619_v7 = vpack.c.bf16 %v32_v6, %v31_v4  ;;  %v33_v8 = vld [vmem:[#allocation2 + $0x20] sm:$0xff]  ;;  %v34_v9 = vld [vmem:[#allocation2 + $0x28] sm:$0xff]  ;;  %v123_v12 = vld [vmem:[#allocation2 + $0x90] sm:$0xff] }
  0x15   :  { %v121_v10 = vld [vmem:[#allocation2 + $0x80] sm:$0xff]  ;;  %v122_v11 = vld [vmem:[#allocation2 + $0x88] sm:$0xff]  ;;  %v124_v13 = vld [vmem:[#allocation2 + $0x98] sm:$0xff]  ;;  %v622_v14 = vpack.c.bf16 %v34_v9, %v33_v8 }
  0x16   :  { %617 = vmatpush3.bf16.msra.mxu0 %v616_v5  ;;  %v640_v15 = vpack.c.bf16 %v122_v11, %v121_v10  ;;  %v35_v16 = vld [vmem:[#allocation2 + $0x30] sm:$0xff]  ;;  %v36_v17 = vld [vmem:[#allocation2 + $0x38] sm:$0xff]  ;;  %v643_v18 = vpack.c.bf16 %v124_v13, %v123_v12  ;;  %v125_v19 = vld [vmem:[#allocation2 + $0xa0] sm:$0xff] }
  0x17   :  { %618 = vmatprep.subr.bf16.mxu0 %v744_v0  ;;  %v126_v20 = vld [vmem:[#allocation2 + $0xa8] sm:$0xff]  ;;  %v625_v21 = vpack.c.bf16 %v36_v17, %v35_v16  ;;  %v37_v22 = vld [vmem:[#allocation2 + $0x40] sm:$0xff]  ;;  %v127_v25 = vld [vmem:[#allocation2 + $0xb0] sm:$0xff] }
  0x18   :  { %641 = vmatpush3.bf16.msra.mxu1 %v640_v15  ;;  %v38_v23 = vld [vmem:[#allocation2 + $0x48] sm:$0xff]  ;;  %v646_v24 = vpack.c.bf16 %v126_v20, %v125_v19  ;;  %v128_v26 = vld [vmem:[#allocation2 + $0xb8] sm:$0xff]  ;;  %v39_v28 = vld [vmem:[#allocation2 + $0x50] sm:$0xff] }
  0x19   :  { %642 = vmatprep.subr.bf16.mxu1 %v744_v0  ;;  %v628_v27 = vpack.c.bf16 %v38_v23, %v37_v22  ;;  %v40_v29 = vld [vmem:[#allocation2 + $0x58] sm:$0xff]  ;;  %v649_v30 = vpack.c.bf16 %v128_v26, %v127_v25  ;;  %v129_v31 = vld [vmem:[#allocation2 + $0xc0] sm:$0xff]  ;;  %v130_v32 = vld [vmem:[#allocation2 + $0xc8] sm:$0xff] }
  0x1a   :  { %620 = vmatpush3.bf16.msra.mxu0 %v619_v7  ;;  %v631_v33 = vpack.c.bf16 %v40_v29, %v39_v28  ;;  %v41_v34 = vld [vmem:[#allocation2 + $0x60] sm:$0xff]  ;;  %v42_v35 = vld [vmem:[#allocation2 + $0x68] sm:$0xff]  ;;  %v652_v36 = vpack.c.bf16 %v130_v32, %v129_v31  ;;  %v131_v37 = vld [vmem:[#allocation2 + $0xd0] sm:$0xff] }
  0x1b   :  { %621 = vmatprep.subr.bf16.mxu0 %v744_v0  ;;  %v132_v38 = vld [vmem:[#allocation2 + $0xd8] sm:$0xff]  ;;  %v634_v39 = vpack.c.bf16 %v42_v35, %v41_v34  ;;  %v43_v40 = vld [vmem:[#allocation2 + $0x70] sm:$0xff]  ;;  %v133_v43 = vld [vmem:[#allocation2 + $0xe0] sm:$0xff] }
  0x1c   :  { %644 = vmatpush3.bf16.msra.mxu1 %v643_v18  ;;  %v44_v41 = vld [vmem:[#allocation2 + $0x78] sm:$0xff]  ;;  %v655_v42 = vpack.c.bf16 %v132_v38, %v131_v37  ;;  %v134_v44 = vld [vmem:[#allocation2 + $0xe8] sm:$0xff]  ;;  %v28_v47 = vld [vmem:[%s840_s0] sm:$0xff] }
  0x1d   :  { %645 = vmatprep.subr.bf16.mxu1 %v744_v0  ;;  %v637_v45 = vpack.c.bf16 %v44_v41, %v43_v40  ;;  %v658_v46 = vpack.c.bf16 %v134_v44, %v133_v43  ;;  %v135_v48 = vld [vmem:[#allocation2 + $0xf0] sm:$0xff]  ;;  %v136_v49 = vld [vmem:[#allocation2 + $0xf8] sm:$0xff]  ;;  %v213_v51 = vld [vmem:[#allocation2 + $0x100] sm:$0xff] }
  0x1e   :  { %623 = vmatpush3.bf16.msra.mxu0 %v622_v14  ;;  %v661_v50 = vpack.c.bf16 %v136_v49, %v135_v48  ;;  %v214_v52 = vld [vmem:[#allocation2 + $0x108] sm:$0xff]  ;;  %v215_v53 = vld [vmem:[#allocation2 + $0x110] sm:$0xff]  ;;  %v216_v55 = vld [vmem:[#allocation2 + $0x118] sm:$0xff] }
  0x1f   :  { %624 = vmatprep.subr.bf16.mxu0 %v744_v0  ;;  %v664_v54 = vpack.c.bf16 %v214_v52, %v213_v51  ;;  %v667_v56 = vpack.c.bf16 %v216_v55, %v215_v53  ;;  %v217_v57 = vld [vmem:[#allocation2 + $0x120] sm:$0xff]  ;;  %v218_v58 = vld [vmem:[#allocation2 + $0x128] sm:$0xff]  ;;  %v219_v60 = vld [vmem:[#allocation2 + $0x130] sm:$0xff] }
  0x20   :  { %647 = vmatpush3.bf16.msra.mxu1 %v646_v24  ;;  %v670_v59 = vpack.c.bf16 %v218_v58, %v217_v57  ;;  %v220_v61 = vld [vmem:[#allocation2 + $0x138] sm:$0xff]  ;;  %v221_v63 = vld [vmem:[#allocation2 + $0x140] sm:$0xff]  ;;  %v222_v2 = vld [vmem:[#allocation2 + $0x148] sm:$0xff] }
  0x21   :  { %648 = vmatprep.subr.bf16.mxu1 %v744_v0  ;;  %v673_v62 = vpack.c.bf16 %v220_v61, %v219_v60  ;;  %v676_v3 = vpack.c.bf16 %v222_v2, %v221_v63  ;;  %v223_v4 = vld [vmem:[#allocation2 + $0x150] sm:$0xff]  ;;  %v224_v5 = vld [vmem:[#allocation2 + $0x158] sm:$0xff]  ;;  %v225_v7 = vld [vmem:[#allocation2 + $0x160] sm:$0xff] }
  0x22   :  { %626 = vmatpush3.bf16.msra.mxu0 %v625_v21  ;;  %v679_v6 = vpack.c.bf16 %v224_v5, %v223_v4  ;;  %v226_v8 = vld [vmem:[#allocation2 + $0x168] sm:$0xff]  ;;  %v403_v10 = vld [vmem:[%s842_s2] ss:$0 sm:$0xff]  ;;  %v227_v14 = vld [vmem:[#allocation2 + $0x170] sm:$0xff] }
  0x23   :  { %627 = vmatprep.subr.bf16.mxu0 %v744_v0  ;;  %v682_v9 = vpack.c.bf16 %v226_v8, %v225_v7  ;;  %v228_v15 = vld [vmem:[#allocation2 + $0x178] sm:$0xff]  ;;  %v305_v17 = vld [vmem:[#allocation2 + $0x180] sm:$0xff]  ;;  %v306_v18 = vld [vmem:[#allocation2 + $0x188] sm:$0xff] }
  0x24   :  { %650 = vmatpush3.bf16.msra.mxu1 %v649_v30  ;;  %v685_v16 = vpack.c.bf16 %v228_v15, %v227_v14  ;;  %v307_v19 = vld [vmem:[#allocation2 + $0x190] sm:$0xff]  ;;  %v688_v20 = vpack.c.bf16 %v306_v18, %v305_v17  ;;  %v308_v21 = vld [vmem:[#allocation2 + $0x198] sm:$0xff]  ;;  %v309_v23 = vld [vmem:[#allocation2 + $0x1a0] sm:$0xff] }
  0x25   :  { %651 = vmatprep.subr.bf16.mxu1 %v744_v0  ;;  %v691_v22 = vpack.c.bf16 %v308_v21, %v307_v19  ;;  %v310_v24 = vld [vmem:[#allocation2 + $0x1a8] sm:$0xff]  ;;  %v312_v26 = vld [vmem:[#allocation2 + $0x1b8] sm:$0xff]  ;;  %v313_v28 = vld [vmem:[#allocation2 + $0x1c0] sm:$0xff] }
  0x26   :  { %629 = vmatpush3.bf16.msra.mxu0 %v628_v27  ;;  %v694_v25 = vpack.c.bf16 %v310_v24, %v309_v23  ;;  %v314_v29 = vld [vmem:[#allocation2 + $0x1c8] sm:$0xff]  ;;  %v315_v31 = vld [vmem:[#allocation2 + $0x1d0] sm:$0xff]  ;;  %v316_v32 = vld [vmem:[#allocation2 + $0x1d8] sm:$0xff] }
  0x27   :  { %630 = vmatprep.subr.bf16.mxu0 %v744_v0  ;;  %v700_v30 = vpack.c.bf16 %v314_v29, %v313_v28  ;;  %v317_v34 = vld [vmem:[#allocation2 + $0x1e0] sm:$0xff]  ;;  %v318_v35 = vld [vmem:[#allocation2 + $0x1e8] sm:$0xff]  ;;  %v319_v41 = vld [vmem:[#allocation2 + $0x1f0] sm:$0xff] }
  0x28   :  { %653 = vmatpush3.bf16.msra.mxu1 %v652_v36  ;;  %v706_v36 = vpack.c.bf16 %v318_v35, %v317_v34  ;;  %v404_v37 = vld [vmem:[%s842_s2 + $0x1] ss:$0 sm:$0xff] }
  0x29   :  { %654 = vmatprep.subr.bf16.mxu1 %v744_v0 }
  0x2a   :  { %632 = vmatpush3.bf16.msra.mxu0 %v631_v33  ;;  %v703_v33 = vpack.c.bf16 %v316_v32, %v315_v31 }
  0x2b   :  { %633 = vmatprep.subr.bf16.mxu0 %v744_v0 }
  0x2c   :  { %656 = vmatpush3.bf16.msra.mxu1 %v655_v42  ;;  %v320_v42 = vld [vmem:[#allocation2 + $0x1f8] sm:$0xff] }
  0x2d   :  { %657 = vmatprep.subr.bf16.mxu1 %v744_v0  ;;  %v709_v43 = vpack.c.bf16 %v320_v42, %v319_v41 }
  0x2e   :  { %635 = vmatpush3.bf16.msra.mxu0 %v634_v39 }
  0x2f   :  { %636 = vmatprep.subr.bf16.mxu0 %v744_v0 }
  0x30   :  { %659 = vmatpush3.bf16.msra.mxu1 %v658_v46 }
  0x31   :  { %660 = vmatprep.subr.bf16.mxu1 %v744_v0 }
  0x32   :  { %638 = vmatpush3.bf16.msra.mxu0 %v637_v45 }
  0x33   :  { %663 = vmatprep.subr.bf16.mxu0 %v744_v0 }
  0x34   :  { %662 = vmatpush3.bf16.msra.mxu1 %v661_v50 }
  0x35   :  { %508 = vmatmul.mubr.f32.vlgmr.msra.gmra.mrb[0].mxu0 %v28_v47  ;;  %687 = vmatprep.subr.bf16.mxu1 %v744_v0  ;;  %v406_v47 = vld [vmem:[%s842_s2 + $0x3] ss:$0 sm:$0xff] }
  0x36   :  { %577 = vmatprep.mubr.msk.f32.mxu0 %vm745_vm0, %v746_v1  ;;  %665 = vmatpush3.bf16.msra.mxu0 %v664_v54 }
  0x37   :  { %666 = vmatprep.subr.bf16.mxu0 %v744_v0 }
  0x3a   :  { %668 = vmatpush3.bf16.msra.mxu0 %v667_v56 }
  0x3b   :  { %669 = vmatprep.subr.bf16.mxu0 %v744_v0 }
  0x3e   :  { %671 = vmatpush3.bf16.msra.mxu0 %v670_v59 }
  0x3f   :  { %672 = vmatprep.subr.bf16.mxu0 %v744_v0 }
  0x42   :  { %674 = vmatpush3.bf16.msra.mxu0 %v673_v62 }
  0x43   :  { %675 = vmatprep.subr.bf16.mxu0 %v744_v0 }
  0x46   :  { %677 = vmatpush3.bf16.msra.mxu0 %v676_v3 }
  0x47   :  { %678 = vmatprep.subr.bf16.mxu0 %v744_v0 }
  0x4a   :  { %680 = vmatpush3.bf16.msra.mxu0 %v679_v6 }
  0x4b   :  { %681 = vmatprep.subr.bf16.mxu0 %v744_v0 }
  0x4e   :  { %683 = vmatpush3.bf16.msra.mxu0 %v682_v9 }
  0x4f   :  { %684 = vmatprep.subr.bf16.mxu0 %v744_v0 }
  0x52   :  { %686 = vmatpush3.bf16.msra.mxu0 %v685_v16 }
 0x108   :  { %v116_v11 = vpop.f32.mrb[0].mxu0 }
 0x109   :  { %v117_v12 = vadd.f32 %v403_v10, %v116_v11  ;;  %v509_v13 = vpop.f32.mrb[1].mxu0 }
 0x10b   :  { %543 = vmatmul.mubr.f32.vlgmr.msra.gmra.mrb[0].mxu1 %v117_v12 }
 0x10c   :  { %612 = vmatprep.mubr.msk.f32.mxu1 %vm745_vm0, %v746_v1  ;;  %689 = vmatpush3.bf16.msra.mxu1 %v688_v20  ;;  %v311_v1 = vld [vmem:[#allocation2 + $0x1b0] sm:$0xff] }
 0x10d   :  { %690 = vmatprep.subr.bf16.mxu1 %v744_v0  ;;  %v697_v27 = vpack.c.bf16 %v312_v26, %v311_v1 }
 0x110   :  { %692 = vmatpush3.bf16.msra.mxu1 %v691_v22 }
 0x111   :  { %693 = vmatprep.subr.bf16.mxu1 %v744_v0 }
 0x114   :  { %695 = vmatpush3.bf16.msra.mxu1 %v694_v25 }
 0x115   :  { %696 = vmatprep.subr.bf16.mxu1 %v744_v0 }
 0x118   :  { %698 = vmatpush3.bf16.msra.mxu1 %v697_v27 }
 0x119   :  { %699 = vmatprep.subr.bf16.mxu1 %v744_v0 }
 0x11c   :  { %701 = vmatpush3.bf16.msra.mxu1 %v700_v30 }
 0x11d   :  { %702 = vmatprep.subr.bf16.mxu1 %v744_v0 }
 0x120   :  { %704 = vmatpush3.bf16.msra.mxu1 %v703_v33 }
 0x121   :  { %705 = vmatprep.subr.bf16.mxu1 %v744_v0 }
 0x124   :  { %707 = vmatpush3.bf16.msra.mxu1 %v706_v36 }
 0x125   :  { %708 = vmatprep.subr.bf16.mxu1 %v744_v0  ;;  %v405_v0 = vld [vmem:[%s842_s2 + $0x2] ss:$0 sm:$0xff] }
 0x128   :  { %710 = vmatpush3.bf16.msra.mxu1 %v709_v43 }
 0x1de   :  { %v208_v38 = vpop.f32.mrb[0].mxu1 }
 0x1df   :  { %v209_v39 = vadd.f32 %v404_v37, %v208_v38  ;;  %v544_v40 = vpop.f32.mrb[1].mxu1 }
 0x1e1   :  { %397 = vst [vmem:[%s843_s3 + $0x8] sm:$0xff] %v209_v39  ;;  %578 = vmatmul.mubr.f32.vlgmr.msra.gmra.mrb[2].mxu0 %v209_v39 }
 0x2b4   :  { %v300_v44 = vpop.f32.mrb[2].mxu0 }
 0x2b5   :  { %v301_v45 = vadd.f32 %v405_v0, %v300_v44  ;;  %v579_v46 = vpop.f32.mrb[3].mxu0 }
 0x2b7   :  { %613 = vmatmul.mubr.f32.vlgmr.msra.gmra.mrb[2].mxu1 %v301_v45 }
 0x38a   :  { %v392_v48 = vpop.f32.mrb[2].mxu1 }
 0x38b   :  { %v393_v49 = vadd.f32 %v406_v47, %v392_v48  ;;  %v614_v50 = vpop.f32.mrb[3].mxu1 }
 0x38d   :  { %396 = vst [vmem:[%s843_s3] sm:$0xff] %v393_v49 }
 0x38e   :  { %402 = vsyncpa [#allocation3], 1 }

</bundles_post_ra>
